<compile_context>
chip_gen: v7x
topology: tpu7x:2x2x1
jax: 0.10.0
libtpu: 0.0.40
codegen_flags: <defaults>
</compile_context>

<pallas_src>
import jax
import jax.numpy as jnp
from jax.experimental import pallas as pl
from jax.experimental.pallas import tpu as pltpu

LN_EPS = 1e-5
LEAKY_SLOPE = 0.01   # PyTorch F.leaky_relu default
PAD_OUT = 128        # lane-dense padded width of the output layer


def _layernorm(h, gamma, beta):
    # One-pass LN: single sum + sum-of-squares (halves XLU reductions).
    # NOTE(v6e): if the bundle dump shows the XLU binding on the bf16 path,
    # these reductions can be moved onto the MXU (dot with a ones column);
    # not done by default since it hurts the v5e f32 path.
    n = h.shape[-1]
    inv_n = 1.0 / n
    s = jnp.sum(h, axis=-1, keepdims=True)
    s2 = jnp.sum(h * h, axis=-1, keepdims=True)
    mu = s * inv_n
    var = jnp.maximum(s2 * inv_n - mu * mu, 0.0)
    return (h - mu) * jax.lax.rsqrt(var + LN_EPS) * gamma + beta


def _leaky_relu(h):
    return jnp.where(h > 0, h, LEAKY_SLOPE * h)


def dqn_kernel(x_ref,
               w1_ref, b1_ref, g1_ref, be1_ref,
               w2_ref, b2_ref, g2_ref, be2_ref,
               w3_ref, b3_ref,
               o_ref):
    mm_dtype = w1_ref.dtype                      # bf16 (default) or f32 MXU operands
    x = x_ref[...].astype(mm_dtype)

    # linear1 (weight-norm folded) + LayerNorm + leaky_relu (f32 math)
    h = jnp.dot(x, w1_ref[...], preferred_element_type=jnp.float32) + b1_ref[...]
    h = _leaky_relu(_layernorm(h, g1_ref[...], be1_ref[...]))

    # TODO(synk): Dropout(p=0.2) is stochastic (train mode); implemented as
    # identity (eval-mode semantics).

    # linear2 + LayerNorm + leaky_relu
    h = jnp.dot(h.astype(mm_dtype), w2_ref[...],
                preferred_element_type=jnp.float32) + b2_ref[...]
    h = _leaky_relu(_layernorm(h, g2_ref[...], be2_ref[...]))

    # output layer (lane-dense: padded to 128 columns, zeros beyond n_actions)
    q = jnp.dot(h.astype(mm_dtype), w3_ref[...],
                preferred_element_type=jnp.float32) + b3_ref[...]
    o_ref[...] = q.astype(o_ref.dtype)


def dqn_forward(state, params, *, num_actions, block_b=512, out_dtype=None):
    """state: (B, state_size) f32. params: dict of effective (folded) weights
    (w1/w2/w3 already in their MXU dtype, output layer pre-padded to PAD_OUT
    lanes). Returns (B, num_actions) in f32."""
    B, S = state.shape

    mm_dtype = params["w1"].dtype
    if out_dtype is None:
        # bf16 output on the bf16 path halves the dominant HBM write stream.
        out_dtype = mm_dtype

    # Batch tile: multiple of 8 (f32 sublanes), no bigger than B.
    TB = min(block_b, B)
    TB = max(8, (TB // 8) * 8)
    Bp = pl.cdiv(B, TB) * TB
    # Guarantee >= 2 grid tiles (when the batch allows) so the "parallel"
    # batch axis shards across both TensorCores on v7x instead of idling one.
    if Bp // TB < 2 and Bp >= 16:
        TB = max(8, ((Bp // 2) // 8) * 8)
        Bp = pl.cdiv(B, TB) * TB
    if Bp != B:
        state = jnp.pad(state, ((0, Bp - B), (0, 0)))

    args = (
        state,
        params["w1"], params["b1"], params["ln1_g"], params["ln1_b"],
        params["w2"], params["b2"], params["ln2_g"], params["ln2_b"],
        params["w3"], params["b3"],
    )

    def const_spec(a):
        # Constant index_map: DMA'd once, held VMEM-resident across the grid.
        return pl.BlockSpec(a.shape, lambda i: (0, 0))

    in_specs = [pl.BlockSpec((TB, S), lambda i: (i, 0))] + [const_spec(a) for a in args[1:]]
    out_spec = pl.BlockSpec((TB, PAD_OUT), lambda i: (i, 0))

    out = pl.pallas_call(
        dqn_kernel,
        out_shape=jax.ShapeDtypeStruct((Bp, PAD_OUT), out_dtype),
        grid=(Bp // TB,),
        in_specs=in_specs,
        out_specs=out_spec,
        compiler_params=pltpu.CompilerParams(
            dimension_semantics=("parallel",)),
    )(*args)

    return out[:B, :num_actions].astype(jnp.float32)


def _weight_norm_fold(v, g):
    """PyTorch weight_norm (dim=0) for Linear weight v of shape (out, in):
    w = g * v / ||v||_row, g shape (out,). Returns (in, out) for x @ W."""
    norm = jnp.sqrt(jnp.sum(v * v, axis=1, keepdims=True))
    w = (g[:, None] / norm) * v
    return w.T  # (in, out)


def cast_matmul_weights(params, matmul_dtype=jnp.bfloat16):
    """Cast only the MXU operand weights (w1/w2/w3) to matmul_dtype, ONCE.
    Biases / LN params stay f32 (added after f32 accumulation)."""
    p = dict(params)
    for k in ("w1", "w2", "w3"):
        p[k] = params[k].astype(matmul_dtype)
    return p


def init_params(key, state_size=12, h1=128, h2=512, action_size=2):
    ks = jax.random.split(key, 9)
    # raw v (out, in), g (out,), b (out,) -- deterministic synthetic init
    v1 = jax.random.normal(ks[0], (h1, state_size), jnp.float32) * 0.1
    g1 = 1.0 + 0.01 * jax.random.normal(ks[1], (h1,), jnp.float32)
    b1 = 0.01 * jax.random.normal(ks[2], (h1,), jnp.float32)

    v2 = jax.random.normal(ks[3], (h2, h1), jnp.float32) * 0.05
    g2 = 1.0 + 0.01 * jax.random.normal(ks[4], (h2,), jnp.float32)
    b2 = 0.01 * jax.random.normal(ks[5], (h2,), jnp.float32)

    v3 = jax.random.normal(ks[6], (action_size, h2), jnp.float32) * 0.05
    g3 = 1.0 + 0.01 * jax.random.normal(ks[7], (action_size,), jnp.float32)
    b3 = 0.01 * jax.random.normal(ks[8], (action_size,), jnp.float32)

    w3 = _weight_norm_fold(v3, g3)                       # (h2, action_size)
    # Lane-dense padding of the output layer: zero columns up to PAD_OUT.
    w3_pad = jnp.zeros((h2, PAD_OUT), jnp.float32).at[:, :action_size].set(w3)
    b3_pad = jnp.zeros((1, PAD_OUT), jnp.float32).at[:, :action_size].set(b3)

    params = {
        "w1": _weight_norm_fold(v1, g1), "b1": b1.reshape(1, h1),
        "ln1_g": jnp.ones((1, h1), jnp.float32), "ln1_b": jnp.zeros((1, h1), jnp.float32),
        "w2": _weight_norm_fold(v2, g2), "b2": b2.reshape(1, h2),
        "ln2_g": jnp.ones((1, h2), jnp.float32), "ln2_b": jnp.zeros((1, h2), jnp.float32),
        "w3": w3_pad, "b3": b3_pad,
    }
    return params


if __name__ == "__main__":
    key = jax.random.PRNGKey(0)
    k_state, k_param = jax.random.split(key)

    # FlappyBird-v0 (use_lidar=False): observation dim 12, action dim 2.
    B, STATE_SIZE, ACTION_SIZE = 32, 12, 2
    state = jax.random.normal(k_state, (B, STATE_SIZE), jnp.float32)
    params_f32 = init_params(k_param, state_size=STATE_SIZE, action_size=ACTION_SIZE)

    # Reference in plain JAX (eval-mode, identical math, un-padded output cols).
    def ref(x, p):
        h = x @ p["w1"] + p["b1"]
        mu = h.mean(-1, keepdims=True); var = ((h - mu) ** 2).mean(-1, keepdims=True)
        h = (h - mu) / jnp.sqrt(var + LN_EPS) * p["ln1_g"] + p["ln1_b"]
        h = jnp.where(h > 0, h, LEAKY_SLOPE * h)
        h = h @ p["w2"] + p["b2"]
        mu = h.mean(-1, keepdims=True); var = ((h - mu) ** 2).mean(-1, keepdims=True)
        h = (h - mu) / jnp.sqrt(var + LN_EPS) * p["ln2_g"] + p["ln2_b"]
        h = jnp.where(h > 0, h, LEAKY_SLOPE * h)
        return (h @ p["w3"] + p["b3"])[:, :ACTION_SIZE]

    q_ref = ref(state, params_f32)

    # f32 MXU path (strict check; f32 output).
    q = dqn_forward(state, params_f32, num_actions=ACTION_SIZE)
    jax.block_until_ready(q)
    assert q.shape == (B, ACTION_SIZE)
    assert jnp.allclose(q, q_ref, atol=1e-3, rtol=1e-3)

    # Default fast path: bf16 MXU operands (cast ONCE here, not per call) and
    # bf16 output writeback (loose check).
    params_bf16 = cast_matmul_weights(params_f32, jnp.bfloat16)
    q_bf16 = dqn_forward(state, params_bf16, num_actions=ACTION_SIZE)
    jax.block_until_ready(q_bf16)
    assert q_bf16.shape == (B, ACTION_SIZE)
    assert jnp.allclose(q_bf16, q_ref, atol=5e-2, rtol=5e-2)

    print("KERNEL_OK")
</pallas_src>

<mosaic_0001>
module attributes {stable_mosaic.version = 11 : i64} {
  func.func @dqn_kernel(%arg0: i32, %arg1: memref<16x12xf32, #tpu.memory_space<vmem>>, %arg2: memref<12x128xf32, #tpu.memory_space<vmem>>, %arg3: memref<1x128xf32, #tpu.memory_space<vmem>>, %arg4: memref<1x128xf32, #tpu.memory_space<vmem>>, %arg5: memref<1x128xf32, #tpu.memory_space<vmem>>, %arg6: memref<128x512xf32, #tpu.memory_space<vmem>>, %arg7: memref<1x512xf32, #tpu.memory_space<vmem>>, %arg8: memref<1x512xf32, #tpu.memory_space<vmem>>, %arg9: memref<1x512xf32, #tpu.memory_space<vmem>>, %arg10: memref<512x128xf32, #tpu.memory_space<vmem>>, %arg11: memref<1x128xf32, #tpu.memory_space<vmem>>, %arg12: memref<16x128xf32, #tpu.memory_space<vmem>>) attributes {dimension_semantics = [#tpu.dimension_semantics<parallel>], iteration_bounds = array<i64: 2>, scalar_prefetch = 0 : i64, scratch_operands = 0 : i64, tpu.core_type = #tpu.core_type<tc>, window_params = [{transform_indices = @transform_0, window_bounds = array<i64: 16, 12>}, {pipeline_mode = #tpu.pipeline_mode<synchronous>, transform_indices = @transform_1, window_bounds = array<i64: 12, 128>}, {pipeline_mode = #tpu.pipeline_mode<synchronous>, transform_indices = @transform_2, window_bounds = array<i64: 1, 128>}, {pipeline_mode = #tpu.pipeline_mode<synchronous>, transform_indices = @transform_3, window_bounds = array<i64: 1, 128>}, {pipeline_mode = #tpu.pipeline_mode<synchronous>, transform_indices = @transform_4, window_bounds = array<i64: 1, 128>}, {pipeline_mode = #tpu.pipeline_mode<synchronous>, transform_indices = @transform_5, window_bounds = array<i64: 128, 512>}, {pipeline_mode = #tpu.pipeline_mode<synchronous>, transform_indices = @transform_6, window_bounds = array<i64: 1, 512>}, {pipeline_mode = #tpu.pipeline_mode<synchronous>, transform_indices = @transform_7, window_bounds = array<i64: 1, 512>}, {pipeline_mode = #tpu.pipeline_mode<synchronous>, transform_indices = @transform_8, window_bounds = array<i64: 1, 512>}, {pipeline_mode = #tpu.pipeline_mode<synchronous>, transform_indices = @transform_9, window_bounds = array<i64: 512, 128>}, {pipeline_mode = #tpu.pipeline_mode<synchronous>, transform_indices = @transform_10, window_bounds = array<i64: 1, 128>}, {transform_indices = @transform_11, window_bounds = array<i64: 16, 128>}]} {
    %c0 = arith.constant 0 : index
    %c0_0 = arith.constant 0 : index
    %0 = vector.load %arg1[%c0, %c0_0] : memref<16x12xf32, #tpu.memory_space<vmem>>, vector<16x12xf32>
    %c0_1 = arith.constant 0 : index
    %c0_2 = arith.constant 0 : index
    %1 = vector.load %arg2[%c0_1, %c0_2] : memref<12x128xf32, #tpu.memory_space<vmem>>, vector<12x128xf32>
    %cst = arith.constant dense<0.000000e+00> : vector<16x128xf32>
    %2 = tpu.matmul %0, %1, %cst {dimension_numbers = #tpu.dot_dimension_numbers<[1], [0], [0], [1], [0, 0, 1, 1], [], []>} : vector<16x12xf32>, vector<12x128xf32>, vector<16x128xf32> -> vector<16x128xf32>
    %c0_3 = arith.constant 0 : index
    %c0_4 = arith.constant 0 : index
    %3 = vector.load %arg3[%c0_3, %c0_4] : memref<1x128xf32, #tpu.memory_space<vmem>>, vector<1x128xf32>
    %4 = vector.broadcast %3 : vector<1x128xf32> to vector<16x128xf32>
    %5 = arith.addf %2, %4 : vector<16x128xf32>
    %c0_5 = arith.constant 0 : index
    %c0_6 = arith.constant 0 : index
    %6 = vector.load %arg4[%c0_5, %c0_6] : memref<1x128xf32, #tpu.memory_space<vmem>>, vector<1x128xf32>
    %c0_7 = arith.constant 0 : index
    %c0_8 = arith.constant 0 : index
    %7 = vector.load %arg5[%c0_7, %c0_8] : memref<1x128xf32, #tpu.memory_space<vmem>>, vector<1x128xf32>
    %cst_9 = arith.constant dense<0.000000e+00> : vector<16xf32>
    %8 = vector.multi_reduction <add>, %5, %cst_9 [1] : vector<16x128xf32> to vector<16xf32>
    %9 = vector.shape_cast %8 : vector<16xf32> to vector<16x1xf32>
    %10 = arith.mulf %5, %5 : vector<16x128xf32>
    %cst_10 = arith.constant dense<0.000000e+00> : vector<16xf32>
    %11 = vector.multi_reduction <add>, %10, %cst_10 [1] : vector<16x128xf32> to vector<16xf32>
    %12 = vector.shape_cast %11 : vector<16xf32> to vector<16x1xf32>
    %cst_11 = arith.constant 7.812500e-03 : f32
    %13 = vector.broadcast %cst_11 : f32 to vector<16x1xf32>
    %14 = arith.mulf %9, %13 : vector<16x1xf32>
    %cst_12 = arith.constant 7.812500e-03 : f32
    %15 = vector.broadcast %cst_12 : f32 to vector<16x1xf32>
    %16 = arith.mulf %12, %15 : vector<16x1xf32>
    %17 = arith.mulf %14, %14 : vector<16x1xf32>
    %18 = arith.subf %16, %17 : vector<16x1xf32>
    %cst_13 = arith.constant 0.000000e+00 : f32
    %19 = vector.broadcast %cst_13 : f32 to vector<16x1xf32>
    %20 = arith.maximumf %18, %19 : vector<16x1xf32>
    %21 = vector.broadcast %14 : vector<16x1xf32> to vector<16x128xf32>
    %22 = arith.subf %5, %21 : vector<16x128xf32>
    %cst_14 = arith.constant 9.99999974E-6 : f32
    %23 = vector.broadcast %cst_14 : f32 to vector<16x1xf32>
    %24 = arith.addf %20, %23 : vector<16x1xf32>
    %25 = math.rsqrt %24 : vector<16x1xf32>
    %26 = vector.broadcast %25 : vector<16x1xf32> to vector<16x128xf32>
    %27 = arith.mulf %22, %26 : vector<16x128xf32>
    %28 = vector.broadcast %6 : vector<1x128xf32> to vector<16x128xf32>
    %29 = arith.mulf %27, %28 : vector<16x128xf32>
    %30 = vector.broadcast %7 : vector<1x128xf32> to vector<16x128xf32>
    %31 = arith.addf %29, %30 : vector<16x128xf32>
    %cst_15 = arith.constant 0.000000e+00 : f32
    %32 = vector.broadcast %cst_15 : f32 to vector<16x128xf32>
    %33 = arith.cmpf ogt, %31, %32 : vector<16x128xf32>
    %cst_16 = arith.constant 0.00999999977 : f32
    %34 = vector.broadcast %cst_16 : f32 to vector<16x128xf32>
    %35 = arith.mulf %34, %31 : vector<16x128xf32>
    %36 = arith.select %33, %31, %35 : vector<16x128xi1>, vector<16x128xf32>
    %c0_17 = arith.constant 0 : index
    %c0_18 = arith.constant 0 : index
    %37 = vector.load %arg6[%c0_17, %c0_18] : memref<128x512xf32, #tpu.memory_space<vmem>>, vector<128x512xf32>
    %cst_19 = arith.constant dense<0.000000e+00> : vector<16x512xf32>
    %38 = tpu.matmul %36, %37, %cst_19 {dimension_numbers = #tpu.dot_dimension_numbers<[1], [0], [0], [1], [0, 0, 1, 1], [], []>} : vector<16x128xf32>, vector<128x512xf32>, vector<16x512xf32> -> vector<16x512xf32>
    %c0_20 = arith.constant 0 : index
    %c0_21 = arith.constant 0 : index
    %39 = vector.load %arg7[%c0_20, %c0_21] : memref<1x512xf32, #tpu.memory_space<vmem>>, vector<1x512xf32>
    %40 = vector.broadcast %39 : vector<1x512xf32> to vector<16x512xf32>
    %41 = arith.addf %38, %40 : vector<16x512xf32>
    %c0_22 = arith.constant 0 : index
    %c0_23 = arith.constant 0 : index
    %42 = vector.load %arg8[%c0_22, %c0_23] : memref<1x512xf32, #tpu.memory_space<vmem>>, vector<1x512xf32>
    %c0_24 = arith.constant 0 : index
    %c0_25 = arith.constant 0 : index
    %43 = vector.load %arg9[%c0_24, %c0_25] : memref<1x512xf32, #tpu.memory_space<vmem>>, vector<1x512xf32>
    %cst_26 = arith.constant dense<0.000000e+00> : vector<16xf32>
    %44 = vector.multi_reduction <add>, %41, %cst_26 [1] : vector<16x512xf32> to vector<16xf32>
    %45 = vector.shape_cast %44 : vector<16xf32> to vector<16x1xf32>
    %46 = arith.mulf %41, %41 : vector<16x512xf32>
    %cst_27 = arith.constant dense<0.000000e+00> : vector<16xf32>
    %47 = vector.multi_reduction <add>, %46, %cst_27 [1] : vector<16x512xf32> to vector<16xf32>
    %48 = vector.shape_cast %47 : vector<16xf32> to vector<16x1xf32>
    %cst_28 = arith.constant 0.001953125 : f32
    %49 = vector.broadcast %cst_28 : f32 to vector<16x1xf32>
    %50 = arith.mulf %45, %49 : vector<16x1xf32>
    %cst_29 = arith.constant 0.001953125 : f32
    %51 = vector.broadcast %cst_29 : f32 to vector<16x1xf32>
    %52 = arith.mulf %48, %51 : vector<16x1xf32>
    %53 = arith.mulf %50, %50 : vector<16x1xf32>
    %54 = arith.subf %52, %53 : vector<16x1xf32>
    %cst_30 = arith.constant 0.000000e+00 : f32
    %55 = vector.broadcast %cst_30 : f32 to vector<16x1xf32>
    %56 = arith.maximumf %54, %55 : vector<16x1xf32>
    %57 = vector.broadcast %50 : vector<16x1xf32> to vector<16x512xf32>
    %58 = arith.subf %41, %57 : vector<16x512xf32>
    %cst_31 = arith.constant 9.99999974E-6 : f32
    %59 = vector.broadcast %cst_31 : f32 to vector<16x1xf32>
    %60 = arith.addf %56, %59 : vector<16x1xf32>
    %61 = math.rsqrt %60 : vector<16x1xf32>
    %62 = vector.broadcast %61 : vector<16x1xf32> to vector<16x512xf32>
    %63 = arith.mulf %58, %62 : vector<16x512xf32>
    %64 = vector.broadcast %42 : vector<1x512xf32> to vector<16x512xf32>
    %65 = arith.mulf %63, %64 : vector<16x512xf32>
    %66 = vector.broadcast %43 : vector<1x512xf32> to vector<16x512xf32>
    %67 = arith.addf %65, %66 : vector<16x512xf32>
    %cst_32 = arith.constant 0.000000e+00 : f32
    %68 = vector.broadcast %cst_32 : f32 to vector<16x512xf32>
    %69 = arith.cmpf ogt, %67, %68 : vector<16x512xf32>
    %cst_33 = arith.constant 0.00999999977 : f32
    %70 = vector.broadcast %cst_33 : f32 to vector<16x512xf32>
    %71 = arith.mulf %70, %67 : vector<16x512xf32>
    %72 = arith.select %69, %67, %71 : vector<16x512xi1>, vector<16x512xf32>
    %c0_34 = arith.constant 0 : index
    %c0_35 = arith.constant 0 : index
    %73 = vector.load %arg10[%c0_34, %c0_35] : memref<512x128xf32, #tpu.memory_space<vmem>>, vector<512x128xf32>
    %cst_36 = arith.constant dense<0.000000e+00> : vector<16x128xf32>
    %74 = tpu.matmul %72, %73, %cst_36 {dimension_numbers = #tpu.dot_dimension_numbers<[1], [0], [0], [1], [0, 0, 1, 1], [], []>} : vector<16x512xf32>, vector<512x128xf32>, vector<16x128xf32> -> vector<16x128xf32>
    %c0_37 = arith.constant 0 : index
    %c0_38 = arith.constant 0 : index
    %75 = vector.load %arg11[%c0_37, %c0_38] : memref<1x128xf32, #tpu.memory_space<vmem>>, vector<1x128xf32>
    %76 = vector.broadcast %75 : vector<1x128xf32> to vector<16x128xf32>
    %77 = arith.addf %74, %76 : vector<16x128xf32>
    %c0_39 = arith.constant 0 : index
    %c0_40 = arith.constant 0 : index
    %78 = vector.load %arg12[%c0_39, %c0_40] : memref<16x128xf32, #tpu.memory_space<vmem>>, vector<16x128xf32>
    tpu.vector_store %arg12[%c0_39, %c0_40], %77 {strides = array<i32>} : memref<16x128xf32, #tpu.memory_space<vmem>>, vector<16x128xf32>,
    return
  }
  func.func @transform_0(%arg0: i32) -> (i32, i32) {
    %c0_i32 = arith.constant 0 : i32
    %c0_i32_0 = arith.constant 0 : i32
    return %arg0, %c0_i32 : i32, i32
  }
  func.func @transform_1(%arg0: i32) -> (i32, i32) {
    %c0_i32 = arith.constant 0 : i32
    %c0_i32_0 = arith.constant 0 : i32
    %c0_i32_1 = arith.constant 0 : i32
    return %c0_i32, %c0_i32_0 : i32, i32
  }
  func.func @transform_2(%arg0: i32) -> (i32, i32) {
    %c0_i32 = arith.constant 0 : i32
    %c0_i32_0 = arith.constant 0 : i32
    %c0_i32_1 = arith.constant 0 : i32
    return %c0_i32, %c0_i32_0 : i32, i32
  }
  func.func @transform_3(%arg0: i32) -> (i32, i32) {
    %c0_i32 = arith.constant 0 : i32
    %c0_i32_0 = arith.constant 0 : i32
    %c0_i32_1 = arith.constant 0 : i32
    return %c0_i32, %c0_i32_0 : i32, i32
  }
  func.func @transform_4(%arg0: i32) -> (i32, i32) {
    %c0_i32 = arith.constant 0 : i32
    %c0_i32_0 = arith.constant 0 : i32
    %c0_i32_1 = arith.constant 0 : i32
    return %c0_i32, %c0_i32_0 : i32, i32
  }
  func.func @transform_5(%arg0: i32) -> (i32, i32) {
    %c0_i32 = arith.constant 0 : i32
    %c0_i32_0 = arith.constant 0 : i32
    %c0_i32_1 = arith.constant 0 : i32
    return %c0_i32, %c0_i32_0 : i32, i32
  }
  func.func @transform_6(%arg0: i32) -> (i32, i32) {
    %c0_i32 = arith.constant 0 : i32
    %c0_i32_0 = arith.constant 0 : i32
    %c0_i32_1 = arith.constant 0 : i32
    return %c0_i32, %c0_i32_0 : i32, i32
  }
  func.func @transform_7(%arg0: i32) -> (i32, i32) {
    %c0_i32 = arith.constant 0 : i32
    %c0_i32_0 = arith.constant 0 : i32
    %c0_i32_1 = arith.constant 0 : i32
    return %c0_i32, %c0_i32_0 : i32, i32
  }
  func.func @transform_8(%arg0: i32) -> (i32, i32) {
    %c0_i32 = arith.constant 0 : i32
    %c0_i32_0 = arith.constant 0 : i32
    %c0_i32_1 = arith.constant 0 : i32
    return %c0_i32, %c0_i32_0 : i32, i32
  }
  func.func @transform_9(%arg0: i32) -> (i32, i32) {
    %c0_i32 = arith.constant 0 : i32
    %c0_i32_0 = arith.constant 0 : i32
    %c0_i32_1 = arith.constant 0 : i32
    return %c0_i32, %c0_i32_0 : i32, i32
  }
  func.func @transform_10(%arg0: i32) -> (i32, i32) {
    %c0_i32 = arith.constant 0 : i32
    %c0_i32_0 = arith.constant 0 : i32
    %c0_i32_1 = arith.constant 0 : i32
    return %c0_i32, %c0_i32_0 : i32, i32
  }
  func.func @transform_11(%arg0: i32) -> (i32, i32) {
    %c0_i32 = arith.constant 0 : i32
    %c0_i32_0 = arith.constant 0 : i32
    return %arg0, %c0_i32 : i32, i32
  }
}

</mosaic_0001>

<bundles_post_ra>
// kernel: tpu_custom_call.1
= control target key start
LH: loop header
LB: loop body
LE: loop exit
PB: predicated region body
PF: predicated region fallthrough
CT: control target
= control target key end

     0   :  { %16 = vsyncpa [#allocation3], 0  ;;  %s2075_s0 = inlined_call_operand.vmem [shape: f32[32,12], index: 0, kind: input, shape index: {}]   ;;  %s2076_s1 = inlined_call_operand.vmem [shape: f32[12,128], index: 1, kind: input, shape index: {}]   ;;  %s2077_s2 = inlined_call_operand.vmem [shape: f32[1,128], index: 2, kind: input, shape index: {}]   ;;  %s2078_s3 = inlined_call_operand.vmem [shape: f32[1,128], index: 3, kind: input, shape index: {}]   ;;  %s2079_s4 = inlined_call_operand.vmem [shape: f32[1,128], index: 4, kind: input, shape index: {}]   ;;  %s2080_s5 = inlined_call_operand.hbm [shape: f32[128,512], index: 5, kind: input, shape index: {}]   ;;  %s2081_s6 = inlined_call_operand.vmem [shape: f32[1,512], index: 6, kind: input, shape index: {}]   ;;  %s2082_s7 = inlined_call_operand.vmem [shape: f32[1,512], index: 7, kind: input, shape index: {}]   ;;  %s2083_s8 = inlined_call_operand.vmem [shape: f32[1,512], index: 8, kind: input, shape index: {}]   ;;  %s2084_s9 = inlined_call_operand.hbm [shape: f32[512,128], index: 9, kind: input, shape index: {}]   ;;  %s2085_s10 = inlined_call_operand.vmem [shape: f32[1,128], index: 10, kind: input, shape index: {}]   ;;  %s2086_s11 = inlined_call_operand.hbm [shape: f32[32,128], index: 11, kind: output, shape index: {}]  }
   0x1   :  { %17 = vsyncpa [#allocation6], 0 }
   0x2   :  { %18 = vsyncpa [#allocation4], 0 }
   0x3   :  { %20 = vsyncpa [#allocation4 + $0x1], 0  ;;  %s1790_s17 = smov 0   ;;  %s1792_s18 = smov 0  }
   0x4   :  { %s1794_s19 = smov 0   ;;  %s1796_s20 = smov 0  }
   0x5 LB: > { %2095 = sst [smem:[#allocation11_spill]] %s1705_s17  ;;  %s1811_s21 = sadd.s32 4294967295, %s1717_s20   ;;  %s1717_s20 = sphi %s1796_s20, %s2113_s20   ;;  %s1713_s19 = sphi %s1794_s19, %s2118_s19   ;;  %s1709_s18 = sphi %s1792_s18, %s2117_s18   ;;  %s1705_s17 = sphi %s1790_s17, %s2116_s17  }
   0x6   : > { %2096 = sst [smem:[#allocation12_spill]] %s1713_s19  ;;  %s1270_s22 = sadd.s32 4294967294, %s1717_s20  }
   0x7   : > { %s1815_s23 = sadd.s32 1, %s1717_s20   ;;  %s269_s24 = sadd.s32 1, %s1713_s19 }
   0x8   : > { %2097 = sst [smem:[#allocation13_spill]] %s1815_s23  ;;  %s266_s25 = ssub.s32 %s1717_s20, %s1815_s23 }
   0x9   : > { %p279_p0 = scmp.ne.s32.totalorder %s1713_s19, %s1709_s18  ;;  %p267_p1 = scmp.eq.s32.totalorder %s266_s25, 0 }
   0xa   : > { %p280_p2 = scmp.eq.s32.totalorder %s1811_s21, 1  ;;  %p285_p3 = scmp.ne.s32.totalorder %s1709_s18, %s1705_s17 }
   0xb   : > { %p286_p4 = scmp.eq.s32.totalorder %s1270_s22, 1  ;;  %p1271_p7 = scmp.ge.s32.totalorder %s1717_s20, 1 }
   0xc   : > { %s1826_s26 = scalar_select %p267_p1, %s1713_s19, %s269_s24  }
   0xd   : > { %p1828_p5 = por %p280_p2, %p279_p0  ;;  %p1832_p6 = por %p286_p4, %p285_p3 }
   0xe   : > { %2098 = sst [smem:[#allocation14_spill]] %s1826_s26  ;;  %p293_p8 = scmp.lt.s32.totalorder %s1717_s20, 3 }
   0xf   : > { %s2099_s27 = scalar_select %p1828_p5, 1, 0 }
  0x10   : > { %s2100_s28 = scalar_select %p1832_p6, 1, 0 }
  0x11   : > { %p2088_p9 = scmp.eq.s32.totalorder %s1811_s21, 0  ;;  %p1839_p10 = pnand %p1271_p7, %p293_p8 }
  0x12   : > { %2101 = sst [smem:[#allocation15_spill]] %s2100_s28  ;;  %s1719_s30 = smov [#allocation2]  }
  0x13   : > { %s2102_s29 = scalar_select %p1839_p10, 1, 0 }
  0x14   : > { %s317_s12 = sshll.u32 %s1719_s30, 4  ;;  %p1525_p11 = pneg %p1839_p10  ;;  %s318_s12 = int_to_ptr.vmem [resolvable:$true] %s317_s12 }
  0x15   : > { %s1720_s14 = smov [#allocation5]   ;;  %s1591_s24 = scalar_lea.hbm %s2080_s5, 8192 }
  0x16   : > { %p1847_p12 = pnand %p2088_p9, %p1525_p11  ;;  %s339_s15 = sshll.u32 %s1720_s14, 4  ;;  %s1851_s15 = int_to_ptr.vmem [resolvable:$true] %s339_s15 }
  0x17   : > { %p1592_p13 = scmp.ne.s32.totalorder %s2080_s5, %s1591_s24  ;;  %p1598_p3 = scmp.lt.u32.totalorder %s1591_s24, %s2080_s5 }
  0x18   : > { %p1593_p0 = pneg %p1847_p12 }
  0x1a   : > { %p1594_p1 = pnand %p1593_p0, %p1592_p13 }
  0x1c   : > { %p1595_p2 = pneg %p1594_p1 }
  0x1e   : > { %p1600_p4 = pnand %p1598_p3, %p1595_p2 }
  0x20   : > { %1603 = shalt.err (!%p1600_p4)
}
  0x21   : > { %s1604_s14 = scalar_lea.vmem %s318_s12, 8192  ;;  %p1612_p9 = scmp.lt.s32.totalorder %s318_s12, %s318_s12 }
  0x22   : > { %p1605_p7 = scmp.ne.s32.totalorder %s318_s12, %s1604_s14  ;;  %p1613_p6 = scmp.lt.s32.totalorder %s1604_s14, %s1604_s14 }
  0x24   : > { %p1607_p8 = pnand %p1605_p7, %p1593_p0  ;;  %p1614_p5 = por %p1613_p6, %p1612_p9 }
  0x26   : > { %p1608_p11 = pneg %p1607_p8 }
  0x28   : > { %p1615_p10 = pnand %p1614_p5, %p1608_p11 }
  0x2a   : > { %1618 = shalt.err (!%p1615_p10)
}
  0x2b   : > { %s1721_s16 = smov 512   ;;  %s1722_s22 = smov 32  }
  0x2c   : > { %1528 = dma.hbm_to_vmem [thread:$0]  (!%p1847_p12), %s2080_s5, 8192, %s318_s12, [#allocation3], %s1721_s16, %s1721_s16, %s1722_s22  }
  0x2d   : > { %s1619_s30 = scalar_lea.hbm %s2084_s9, 8192 }
  0x2e   : > { %p1620_p13 = scmp.ne.s32.totalorder %s2084_s9, %s1619_s30  ;;  %p1626_p9 = scmp.lt.u32.totalorder %s1619_s30, %s2084_s9 }
  0x30   : > { %p1622_p5 = pnand %p1620_p13, %p1593_p0 }
  0x32   : > { %p1623_p6 = pneg %p1622_p5 }
  0x34   : > { %p1628_p10 = pnand %p1626_p9, %p1623_p6 }
  0x36   : > { %1631 = shalt.err (!%p1628_p10)
}
  0x37   : > { %s1632_s12 = scalar_lea.vmem %s1851_s15, 8192  ;;  %p1640_p4 = scmp.lt.s32.totalorder %s1851_s15, %s1851_s15 }
  0x38   : > { %p1633_p1 = scmp.ne.s32.totalorder %s1851_s15, %s1632_s12  ;;  %p1641_p7 = scmp.lt.s32.totalorder %s1632_s12, %s1632_s12 }
  0x3a   : > { %p1635_p2 = pnand %p1633_p1, %p1593_p0  ;;  %p1642_p8 = por %p1641_p7, %p1640_p4 }
  0x3c   : > { %p1636_p3 = pneg %p1635_p2 }
  0x3e   : > { %p1643_p11 = pnand %p1642_p8, %p1636_p3 }
  0x40   : > { %1646 = shalt.err (!%p1643_p11)
}
  0x41   : > { %s1723_s17 = smov 128   ;;  %s1724_s23 = smov 8  }
  0x42   : > { %1531 = dma.hbm_to_vmem [thread:$0]  (!%p1847_p12), %s2084_s9, 8192, %s1851_s15, [#allocation6], %s1723_s17, %s1723_s17, %s1724_s23  }
  0x43   : > { %p2104_p13 = scmp.ne.s32.totalorder %s2102_s29, 0 }
  0x44   : > { %p2105_p0 = scmp.eq.s32.totalorder (!%p2104_p13), %s1811_s21, 0 }
  0x45   : > { %367 = sbr.rel (%p2104_p13) target bundleno = 1111 (0x457), region = 64 }
  0x4c   : > { %1692 = dma.done.wait (%p2105_p0), [#allocation3], 8192   ;;  %p2106_p5 = pmov %p2105_p0 }
  0x4d   : > { %p2107_p6 = pmov %p2105_p0 }
  0x4e   : > { %1694 = vsyncadd (%p2106_p5), [#allocation3], 4294959104 }
  0x4f   : > { %1696 = dma.done.wait (%p2107_p6), [#allocation6], 8192   ;;  %p2108_p9 = pmov %p2105_p0 }
  0x50   : > { %s1279_s13 = sshll.u32 %s1811_s21, 1  ;;  %vm436_vm0 = vcmask 1043456   ;;  %vm429_vm1 = vcmask 97280   ;;  %vm1725_vm2 = vmmov 1   ;;  %v420_v0 = vld [vmem:[%s2076_s1] sm:$0xff]  ;;  %v568_v12 = vld [vmem:[#allocation2 + $0x8] sm:$0xff] }
  0x51   : > { %1698 = vsyncadd (%p2108_p9), [#allocation6], 4294959104  ;;  %p412_p10 = scmp.lt.s32.totalorder %s1279_s13, 3  ;;  %v421_v1 = vld [vmem:[%s2076_s1 + $0x8] sm:$0xf]  ;;  %v572_v13 = vld [vmem:[#allocation2 + $0x28] sm:$0xff] }
  0x52   : > { %vm1382_vm3 = vmpackc.low %vm436_vm0, %vm1725_vm2  ;;  %v1381_v3 = vpack.c.bf16 %v421_v1, %v420_v0  ;;  %v1281_v5 = vld [vmem:[%s2077_s2] ss:$0 sm:$0xff]  ;;  %v570_v14 = vld [vmem:[#allocation2 + $0x18] sm:$0xff]  ;;  %v1387_v15 = vpack.c.bf16 %v572_v13, %v568_v12  ;;  %s408_s24 = sand.u32 1, %s1709_s18   ;;  %s1293_s23 = sshll.u32 %s1811_s21, 8 }
  0x53   : > { %s2120_s13 = smov (!%p412_p10, %s1279_s13), 3  ;;  %v574_v16 = vld [vmem:[#allocation2 + $0x38] sm:$0xff]  ;;  %v567_v17 = vld [vmem:[#allocation2] sm:$0xff]  ;;  %v569_v21 = vld [vmem:[#allocation2 + $0x10] sm:$0xff]  ;;  %s1278_s14 = sshll.u32 %s408_s24, 4 }
  0x54   : > { %s1280_s15 = sshll.u32 %s2120_s13, 3  ;;  %1383 = vmatprep.subr.msk.bf16.mxu0 %vm1382_vm3, %v1381_v3  ;;  %v571_v18 = vld [vmem:[#allocation2 + $0x20] sm:$0xff]  ;;  %v1419_v19 = vpack.c.bf16 %v574_v16, %v570_v14  ;;  %v573_v22 = vld [vmem:[#allocation2 + $0x30] sm:$0xff]  ;;  %1388 = vmatprep.subr.bf16.mxu1 %v1387_v15  ;;  %v576_v24 = vld [vmem:[#allocation2 + $0x48] sm:$0xff]  ;;  %s410_s12 = scalar_lea.vmem [#allocation7], %s1278_s14 }
  0x55   : > { %s415_s19 = scalar_lea.vmem %s2075_s0, %s1280_s15  ;;  %1386 = vmatpush3.bf16.msk.msra.mxu0 %vm1382_vm3, %v1381_v3  ;;  %v1389_v20 = vpack.c.bf16 %v571_v18, %v567_v17  ;;  %v1421_v23 = vpack.c.bf16 %v573_v22, %v569_v21  ;;  %v580_v25 = vld [vmem:[#allocation2 + $0x68] sm:$0xff]  ;;  %v578_v26 = vld [vmem:[#allocation2 + $0x58] sm:$0xff]  ;;  %v575_v29 = vld [vmem:[#allocation2 + $0x40] sm:$0xff]  ;;  %s1186_s17 = sshll.u32 %s410_s12, 4  ;;  %s2027_s17 = int_to_ptr.vmem [resolvable:$true] %s1186_s17 }
  0x56   : > { %v418_v2 = vld [vmem:[%s415_s19] sm:$0xff]  ;;  %v419_v4 = vld [vmem:[%s415_s19 + $0x8] sm:$0xff]  ;;  %1420 = vmatprep.subr.bf16.mxu0 %v1419_v19  ;;  %v1391_v27 = vpack.c.bf16 %v580_v25, %v576_v24  ;;  %v579_v30 = vld [vmem:[#allocation2 + $0x60] sm:$0xff]  ;;  %s2032_s13 = scalar_lea.hbm %s2086_s11, %s1293_s23  ;;  %s2034_s15 = scalar_lea.sflag [#allocation4], %s408_s24 }
  0x57   : > { %1378 = vmatprep.mubr.msk.f32.mxu0 %vm429_vm1, %v418_v2  ;;  %1390 = vmatpush1.bf16.msra.mxu1 %v1389_v20  ;;  %v582_v28 = vld [vmem:[#allocation2 + $0x78] sm:$0xff]  ;;  %v1393_v32 = vpack.c.bf16 %v579_v30, %v575_v29  ;;  %v577_v33 = vld [vmem:[#allocation2 + $0x50] sm:$0xff]  ;;  %v584_v36 = vld [vmem:[#allocation2 + $0x88] sm:$0xff]  ;;  %s1647_s29 = scalar_lea.vmem %s2027_s17, 256  ;;  %p2109_p1 = scmp.ne.s32.totalorder %s2099_s27, 0 }
  0x58   : > { %1379 = vmatmul.mubr.msk.f32.vlgmr.msra.gmra.mrb[0].mxu0 %vm429_vm1, %v419_v4  ;;  %v1423_v31 = vpack.c.bf16 %v582_v28, %v578_v26  ;;  %v581_v34 = vld [vmem:[#allocation2 + $0x70] sm:$0xff]  ;;  %1392 = vmatprep.subr.bf16.mxu1 %v1391_v27  ;;  %v588_v37 = vld [vmem:[#allocation2 + $0xa8] sm:$0xff]  ;;  %v586_v38 = vld [vmem:[#allocation2 + $0x98] sm:$0xff]  ;;  %p1648_p12 = scmp.ne.s32.totalorder %s2027_s17, %s1647_s29  ;;  %s1727_s21 = smov [#allocation7]  }
  0x59   : > { %1422 = vmatpush1.bf16.msra.mxu0 %v1421_v23  ;;  %v1425_v35 = vpack.c.bf16 %v581_v34, %v577_v33  ;;  %v1395_v39 = vpack.c.bf16 %v588_v37, %v584_v36  ;;  %v590_v40 = vld [vmem:[#allocation2 + $0xb8] sm:$0xff]  ;;  %v583_v41 = vld [vmem:[#allocation2 + $0x80] sm:$0xff]  ;;  %v585_v45 = vld [vmem:[#allocation2 + $0x90] sm:$0xff]  ;;  %s1651_s22 = sshll.u32 %s1727_s21, 4  ;;  %s1652_s22 = int_to_ptr.vmem [resolvable:$false] %s1651_s22 }
  0x5a   : > { %1424 = vmatprep.subr.bf16.mxu0 %v1423_v31  ;;  %v587_v42 = vld [vmem:[#allocation2 + $0xa0] sm:$0xff]  ;;  %v1427_v43 = vpack.c.bf16 %v590_v40, %v586_v38  ;;  %v589_v46 = vld [vmem:[#allocation2 + $0xb0] sm:$0xff]  ;;  %v592_v48 = vld [vmem:[#allocation2 + $0xc8] sm:$0xff]  ;;  %p1649_p2 = pnand %p1648_p12, %p2109_p1  ;;  %s1653_s19 = scalar_lea.vmem %s1652_s22, 512 }
  0x5b   : > { %1394 = vmatpush1.bf16.msra.mxu1 %v1393_v32  ;;  %v1397_v44 = vpack.c.bf16 %v587_v42, %v583_v41  ;;  %v1429_v47 = vpack.c.bf16 %v589_v46, %v585_v45  ;;  %v596_v49 = vld [vmem:[#allocation2 + $0xe8] sm:$0xff]  ;;  %v594_v50 = vld [vmem:[#allocation2 + $0xd8] sm:$0xff]  ;;  %v591_v53 = vld [vmem:[#allocation2 + $0xc0] sm:$0xff]  ;;  %p1654_p4 = scmp.lt.s32.totalorder %s2027_s17, %s1652_s22  ;;  %p1655_p7 = scmp.lt.s32.totalorder %s1653_s19, %s1647_s29 }
  0x5c   : > { %1396 = vmatprep.subr.bf16.mxu1 %v1395_v39  ;;  %v1399_v51 = vpack.c.bf16 %v596_v49, %v592_v48  ;;  %v598_v52 = vld [vmem:[#allocation2 + $0xf8] sm:$0xff]  ;;  %v595_v54 = vld [vmem:[#allocation2 + $0xe0] sm:$0xff]  ;;  %v593_v57 = vld [vmem:[#allocation2 + $0xd0] sm:$0xff]  ;;  %p1650_p3 = pneg %p1649_p2 }
  0x5d   : > { %1426 = vmatpush1.bf16.msra.mxu0 %v1425_v35  ;;  %v1431_v55 = vpack.c.bf16 %v598_v52, %v594_v50  ;;  %v1401_v56 = vpack.c.bf16 %v595_v54, %v591_v53  ;;  %v597_v58 = vld [vmem:[#allocation2 + $0xf0] sm:$0xff]  ;;  %v600_v60 = vld [vmem:[#allocation2 + $0x108] sm:$0xff]  ;;  %v602_v62 = vld [vmem:[#allocation2 + $0x118] sm:$0xff]  ;;  %p1656_p8 = por %p1655_p7, %p1654_p4 }
  0x5e   : > { %1428 = vmatprep.subr.bf16.mxu0 %v1427_v43  ;;  %v1433_v59 = vpack.c.bf16 %v597_v58, %v593_v57  ;;  %v604_v61 = vld [vmem:[#allocation2 + $0x128] sm:$0xff]  ;;  %v606_v0 = vld [vmem:[#allocation2 + $0x138] sm:$0xff]  ;;  %v599_v1 = vld [vmem:[#allocation2 + $0x100] sm:$0xff] }
  0x5f   : > { %1398 = vmatpush1.bf16.msra.mxu1 %v1397_v44  ;;  %v1403_v63 = vpack.c.bf16 %v604_v61, %v600_v60  ;;  %v603_v2 = vld [vmem:[#allocation2 + $0x120] sm:$0xff]  ;;  %v1435_v3 = vpack.c.bf16 %v606_v0, %v602_v62  ;;  %v612_v12 = vld [vmem:[#allocation2 + $0x168] sm:$0xff]  ;;  %v610_v13 = vld [vmem:[#allocation2 + $0x158] sm:$0xff]  ;;  %p1657_p11 = pnand %p1656_p8, %p1650_p3 }
  0x60   : > { %1400 = vmatprep.subr.bf16.mxu1 %v1399_v51  ;;  %v1405_v4 = vpack.c.bf16 %v603_v2, %v599_v1  ;;  %v614_v14 = vld [vmem:[#allocation2 + $0x178] sm:$0xff]  ;;  %v607_v17 = vld [vmem:[#allocation2 + $0x140] sm:$0xff]  ;;  %v609_v19 = vld [vmem:[#allocation2 + $0x150] sm:$0xff] }
  0x61   : > { %1430 = vmatpush1.bf16.msra.mxu0 %v1429_v47  ;;  %v1439_v16 = vpack.c.bf16 %v614_v14, %v610_v13  ;;  %v611_v18 = vld [vmem:[#allocation2 + $0x160] sm:$0xff]  ;;  %v613_v21 = vld [vmem:[#allocation2 + $0x170] sm:$0xff]  ;;  %v616_v22 = vld [vmem:[#allocation2 + $0x188] sm:$0xff] }
  0x62   : > { %1432 = vmatprep.subr.bf16.mxu0 %v1431_v55  ;;  %v1409_v20 = vpack.c.bf16 %v611_v18, %v607_v17  ;;  %v620_v23 = vld [vmem:[#allocation2 + $0x1a8] sm:$0xff]  ;;  %v1441_v24 = vpack.c.bf16 %v613_v21, %v609_v19  ;;  %v618_v26 = vld [vmem:[#allocation2 + $0x198] sm:$0xff]  ;;  %v615_v28 = vld [vmem:[#allocation2 + $0x180] sm:$0xff] }
  0x63   : > { %1402 = vmatpush1.bf16.msra.mxu1 %v1401_v56  ;;  %v1411_v25 = vpack.c.bf16 %v620_v23, %v616_v22  ;;  %v622_v27 = vld [vmem:[#allocation2 + $0x1b8] sm:$0xff]  ;;  %v619_v30 = vld [vmem:[#allocation2 + $0x1a0] sm:$0xff]  ;;  %v617_v31 = vld [vmem:[#allocation2 + $0x190] sm:$0xff]  ;;  %v633_v22 = vlaneseq }
  0x64   : > { %1404 = vmatprep.subr.bf16.mxu1 %v1403_v63  ;;  %v1443_v29 = vpack.c.bf16 %v622_v27, %v618_v26  ;;  %v621_v32 = vld [vmem:[#allocation2 + $0x1b0] sm:$0xff]  ;;  %v624_v33 = vld [vmem:[#allocation2 + $0x1c8] sm:$0xff]  ;;  %v626_v35 = vld [vmem:[#allocation2 + $0x1d8] sm:$0xff]  ;;  %v1413_v36 = vpack.c.bf16 %v619_v30, %v615_v28 }
  0x65   : > { %1434 = vmatpush1.bf16.msra.mxu0 %v1433_v59  ;;  %v628_v34 = vld [vmem:[#allocation2 + $0x1e8] sm:$0xff]  ;;  %v630_v37 = vld [vmem:[#allocation2 + $0x1f8] sm:$0xff]  ;;  %v1445_v38 = vpack.c.bf16 %v621_v32, %v617_v31  ;;  %v623_v40 = vld [vmem:[#allocation2 + $0x1c0] sm:$0xff]  ;;  %v634_v23 = vshrl.u32 %v633_v22, 7 }
  0x66   : > { %1436 = vmatprep.subr.bf16.mxu0 %v1435_v3  ;;  %v1415_v39 = vpack.c.bf16 %v628_v34, %v624_v33  ;;  %v627_v41 = vld [vmem:[#allocation2 + $0x1e0] sm:$0xff]  ;;  %v1447_v42 = vpack.c.bf16 %v630_v37, %v626_v35  ;;  %v625_v43 = vld [vmem:[#allocation2 + $0x1d0] sm:$0xff]  ;;  %v966_v17 = vld [vmem:[#allocation5 + $0x88] sm:$0xff] }
  0x67   : > { %1406 = vmatpush1.bf16.msra.mxu1 %v1405_v4  ;;  %v629_v44 = vld [vmem:[#allocation2 + $0x1f0] sm:$0xff]  ;;  %v1417_v45 = vpack.c.bf16 %v627_v41, %v623_v40  ;;  %v997_v18 = vld [vmem:[#allocation5 + $0x180] sm:$0xff]  ;;  %v1952_v26 = vsub.s32 1, %v634_v23  ;;  %v1954_v27 = vsub.s32 3, %v634_v23 }
  0x68   : > { %v1449_v46 = vpack.c.bf16 %v629_v44, %v625_v43  ;;  %v1285_v2 = vld [vmem:[%s2078_s3] ss:$0 sm:$0xff] }
 0x12b   : > { %v1380_v6 = vpop.f32.mrb[0].mxu0 }
 0x12c   : > { %v1923_v7 = vadd.f32 %v1380_v6, %v1281_v5  ;;  %v506_v8 = vpop.f32.mrb[1].mxu0  ;;  %v605_v6 = vld [vmem:[#allocation2 + $0x130] sm:$0xff] }
 0x12d   : > { %v1925_v9 = vadd.f32 %v1281_v5, %v506_v8  ;;  %v601_v5 = vld [vmem:[#allocation2 + $0x110] sm:$0xff]  ;;  %v608_v8 = vld [vmem:[#allocation2 + $0x148] sm:$0xff] }
 0x12e   : > { %519 = vadd.xlane.f32.xlu1 %v1923_v7  ;;  %v522_v10 = vmul.f32 %v1923_v7, %v1923_v7  ;;  %v1407_v15 = vpack.c.bf16 %v612_v12, %v608_v8 }
 0x12f   : > { %517 = vadd.xlane.f32.xlu0 %v1925_v9  ;;  %v521_v11 = vmul.f32 %v1925_v9, %v1925_v9 }
 0x130   : > { %1408 = vmatprep.subr.bf16.mxu1 %v1407_v15 }
 0x131   : > { %1410 = vmatpush1.bf16.msra.mxu1 %v1409_v20  ;;  %v998_v20 = vld [vmem:[#allocation5 + $0x188] sm:$0xff] }
 0x132   : > { %525 = vadd.xlane.f32.xlu1 %v522_v10  ;;  %v1726_v10 = vmov 0.0   ;;  %1412 = vmatprep.subr.bf16.mxu1 %v1411_v25  ;;  %v1483_v21 = vpack.c.bf16 %v998_v20, %v997_v18  ;;  %v1947_v25 = vsub.s32 2, %v634_v23  ;;  %v983_v20 = vld [vmem:[#allocation5 + $0x110] sm:$0xff] }
 0x133   : > { %523 = vadd.xlane.f32.xlu0 %v521_v11  ;;  %717 = vmatprep.mubr.f32.mxu1 %v1726_v10  ;;  %v1437_v11 = vpack.c.bf16 %v605_v6, %v601_v5  ;;  %v1286_v6 = vld [vmem:[%s2079_s4] ss:$0 sm:$0xff] }
 0x134   : > { %794 = vmatprep.mubr.f32.mxu0 %v1726_v10 }
 0x135   : > { %1438 = vmatpush1.bf16.msra.mxu0 %v1437_v11  ;;  %1414 = vmatpush1.bf16.msra.mxu1 %v1413_v36 }
 0x136   : > { %1440 = vmatprep.subr.bf16.mxu0 %v1439_v16  ;;  %1416 = vmatprep.subr.bf16.mxu1 %v1415_v39  ;;  %v965_v16 = vld [vmem:[#allocation5 + $0x80] sm:$0xff] }
 0x137   : > { %v1451_v19 = vpack.c.bf16 %v966_v17, %v965_v16  ;;  %v951_v16 = vld [vmem:[#allocation5 + $0x10] sm:$0xff]  ;;  %v952_v17 = vld [vmem:[#allocation5 + $0x18] sm:$0xff] }
 0x139   : > { %1442 = vmatpush1.bf16.msra.mxu0 %v1441_v24  ;;  %1418 = vmatpush1.bf16.msra.mxu1 %v1417_v45  ;;  %v1945_v24 = vsub.s32 0, %v634_v23  ;;  %v969_v23 = vld [vmem:[#allocation5 + $0xa0] sm:$0xff] }
 0x13a   : > { %1444 = vmatprep.subr.bf16.mxu0 %v1443_v29  ;;  %1452 = vmatprep.subr.bf16.mxu1 %v1451_v19  ;;  %v1457_v19 = vpack.c.bf16 %v952_v17, %v951_v16  ;;  %v992_v17 = vld [vmem:[#allocation5 + $0x158] sm:$0xff] }
 0x13d   : > { %1446 = vmatpush1.bf16.msra.mxu0 %v1445_v38 }
 0x13e   : > { %1448 = vmatprep.subr.bf16.mxu0 %v1447_v42 }
 0x141   : > { %1450 = vmatpush1.bf16.msra.mxu0 %v1449_v46 }
 0x142   : > { %1484 = vmatprep.subr.bf16.mxu0 %v1483_v21  ;;  %v984_v21 = vld [vmem:[#allocation5 + $0x118] sm:$0xff] }
 0x143   : > { %v1489_v22 = vpack.c.bf16 %v984_v21, %v983_v20 }
 0x1bb   : > { %v520_v47 = vpop.xlane.xlu1 %519 }
 0x1bc   : > { %v528_v48 = vmul.f32 0.0078125, %v520_v47  ;;  %v518_v49 = vpop.xlane.xlu0 %517 }
 0x1bd   : > { %v527_v50 = vmul.f32 0.0078125, %v518_v49 }
 0x1be   : > { %v532_v52 = vmul.f32 %v528_v48, %v528_v48  ;;  %v538_v63 = vsub.f32 %v1923_v7, %v528_v48 }
 0x1bf   : > { %v526_v51 = vpop.xlane.xlu1 %525  ;;  %v531_v55 = vmul.f32 %v527_v50, %v527_v50  ;;  %v537_v1 = vsub.f32 %v1925_v9, %v527_v50 }
 0x1c0   : > { %v530_v53 = vmul.f32 0.0078125, %v526_v51  ;;  %v524_v54 = vpop.xlane.xlu0 %523 }
 0x1c1   : > { %v529_v56 = vmul.f32 0.0078125, %v524_v54 }
 0x1c2   : > { %v534_v57 = vsub.f32 %v530_v53, %v532_v52 }
 0x1c3   : > { %v533_v58 = vsub.f32 %v529_v56, %v531_v55 }
 0x1c4   : > { %v536_v59 = vmax.f32 %v534_v57, 0.0 }
 0x1c5   : > { %v535_v60 = vmax.f32 %v533_v58, 0.0 }
 0x1c6   : > { %v540_v61 = vadd.f32 1e-05, %v536_v59 }
 0x1c7   : > { %v539_v62 = vadd.f32 1e-05, %v535_v60 }
 0x1c8   : > { %1583 = vrsqrt.f32 %v540_v61 }
 0x1c9   : > { %1585 = vrsqrt.f32 %v539_v62 }
 0x1d2   : > { %v1584_v0 = vpop.eup %1583 }
 0x1d3   : > { %v1586_v3 = vpop.eup %1585  ;;  %v544_v4 = vmul.f32 %v1584_v0, %v538_v63 }
 0x1d4   : > { %v543_v5 = vmul.f32 %v1586_v3, %v537_v1 }
 0x1d5   : > { %v552_v8 = vmul.f32 %v1285_v2, %v544_v4  ;;  %v949_v4 = vld [vmem:[#allocation5] sm:$0xff] }
 0x1d6   : > { %v551_v11 = vmul.f32 %v1285_v2, %v543_v5  ;;  %v950_v5 = vld [vmem:[#allocation5 + $0x8] sm:$0xff] }
 0x1d7   : > { %v560_v13 = vadd.f32 %v1286_v6, %v552_v8  ;;  %v1453_v8 = vpack.c.bf16 %v950_v5, %v949_v4  ;;  %v990_v4 = vld [vmem:[#allocation5 + $0x148] sm:$0xff]  ;;  %v975_v5 = vld [vmem:[#allocation5 + $0xd0] sm:$0xff] }
 0x1d8   : > { %v559_v12 = vadd.f32 %v1286_v6, %v551_v11  ;;  %v981_v6 = vld [vmem:[#allocation5 + $0x100] sm:$0xff]  ;;  %v982_v11 = vld [vmem:[#allocation5 + $0x108] sm:$0xff] }
 0x1d9   : > { %v564_v15 = vmul.f32 0.01, %v560_v13  ;;  %vm562_vm5 = vcmp.gt.f32.partialorder %v560_v13, 0.0 }
 0x1da   : > { %vm561_vm4 = vcmp.gt.f32.partialorder %v559_v12, 0.0  ;;  %v563_v7 = vmul.f32 0.01, %v559_v12 }
 0x1db   : > { %v566_v9 = vsel %vm562_vm5, %v560_v13, %v564_v15  ;;  %v967_v13 = vld [vmem:[#allocation5 + $0x90] sm:$0xff] }
 0x1dc   : > { %v565_v14 = vsel %vm561_vm4, %v559_v12, %v563_v7  ;;  %v1485_v12 = vpack.c.bf16 %v982_v11, %v981_v6  ;;  %v968_v7 = vld [vmem:[#allocation5 + $0x98] sm:$0xff]  ;;  %v1007_v11 = vld [vmem:[#allocation5 + $0x1d0] sm:$0xff] }
 0x1dd   : > { %718 = vmatmul.mubr.f32.vlgmr.msra.gmra.mrb[0].mxu1 %v565_v14  ;;  %795 = vmatmul.mubr.f32.vlgmr.msra.gmra.mrb[2].mxu0 %v565_v14  ;;  %v999_v14 = vld [vmem:[#allocation5 + $0x190] sm:$0xff]  ;;  %v1455_v15 = vpack.c.bf16 %v968_v7, %v967_v13 }
 0x1de   : > { %723 = vmatprep.mubr.f32.mxu1 %v1726_v10  ;;  %800 = vmatprep.mubr.f32.mxu0 %v1726_v10  ;;  %v631_v10 = vld [vmem:[%s2081_s6] sm:$0xf] }
 0x1df   : > { %v636_v28 = vrot.slane %v631_v10, %v1945_v24  ;;  %v644_v29 = vrot.slane %v631_v10, %v1947_v25  ;;  %v640_v30 = vrot.slane %v631_v10, %v1952_v26  ;;  %v648_v31 = vrot.slane %v631_v10, %v1954_v27  ;;  %1454 = vmatpush3.bf16.msra.mxu1 %v1453_v8  ;;  %v970_v10 = vld [vmem:[#allocation5 + $0xa8] sm:$0xff]  ;;  %v976_v8 = vld [vmem:[#allocation5 + $0xd8] sm:$0xff] }
 0x1e0   : > { %1486 = vmatpush3.bf16.msra.mxu0 %v1485_v12  ;;  %1456 = vmatprep.subr.bf16.mxu1 %v1455_v15  ;;  %v1008_v12 = vld [vmem:[#allocation5 + $0x1d8] sm:$0xff]  ;;  %v1471_v13 = vpack.c.bf16 %v976_v8, %v975_v5  ;;  %v808_v8 = vld [vmem:[%s2083_s8] sm:$0xf] }
 0x1e1   : > { %724 = vmatmul.mubr.f32.gmra.mrb[2].mxu1 %v566_v9  ;;  %801 = vmatmul.mubr.f32.gmra.mrb[4].mxu0 %v566_v9  ;;  %v1000_v9 = vld [vmem:[#allocation5 + $0x198] sm:$0xff]  ;;  %v1503_v7 = vpack.c.bf16 %v1008_v12, %v1007_v11 }
 0x1e2   : > { %v1487_v18 = vpack.c.bf16 %v1000_v9, %v999_v14  ;;  %v959_v14 = vld [vmem:[#allocation5 + $0x50] sm:$0xff]  ;;  %v960_v15 = vld [vmem:[#allocation5 + $0x58] sm:$0xff] }
 0x1e3   : > { %1458 = vmatpush3.bf16.msra.mxu1 %v1457_v19  ;;  %v991_v9 = vld [vmem:[#allocation5 + $0x150] sm:$0xff]  ;;  %v1473_v16 = vpack.c.bf16 %v960_v15, %v959_v14  ;;  %v978_v19 = vld [vmem:[#allocation5 + $0xe8] sm:$0xff] }
 0x1e4   : > { %1488 = vmatprep.subr.bf16.mxu0 %v1487_v18  ;;  %v977_v18 = vld [vmem:[#allocation5 + $0xe0] sm:$0xff]  ;;  %v1505_v20 = vpack.c.bf16 %v992_v17, %v991_v9 }
 0x1e5   : > { %1490 = vmatpush3.bf16.msra.mxu0 %v1489_v22  ;;  %v1475_v21 = vpack.c.bf16 %v978_v19, %v977_v18  ;;  %v1009_v22 = vld [vmem:[#allocation5 + $0x1e0] sm:$0xff]  ;;  %v900_v18 = vrot.slane %v808_v8, %v1945_v24  ;;  %v908_v19 = vrot.slane %v808_v8, %v1947_v25 }
 0x2b0   : > { %v719_v32 = vpop.f32.mrb[0].mxu1  ;;  %v796_v33 = vpop.f32.mrb[2].mxu0 }
 0x2b1   : > { %v1960_v34 = vadd.f32 %v719_v32, %v636_v28  ;;  %v1962_v35 = vadd.f32 %v796_v33, %v644_v29  ;;  %v721_v36 = vpop.f32.mrb[1].mxu1  ;;  %v798_v37 = vpop.f32.mrb[3].mxu0  ;;  %v954_v32 = vld [vmem:[#allocation5 + $0x28] sm:$0xff] }
 0x2b2   : > { %v1964_v38 = vadd.f32 %v721_v36, %v640_v30  ;;  %v1968_v40 = vadd.f32 %v798_v37, %v648_v31  ;;  %v985_v37 = vld [vmem:[#allocation5 + $0x120] sm:$0xff] }
 0x2b3   : > { %v819_v39 = vmul.f32 %v1960_v34, %v1960_v34  ;;  %v821_v45 = vmul.f32 %v1962_v35, %v1962_v35 }
 0x2b4   : > { %v809_v41 = vadd.f32 %v1964_v38, %v1960_v34  ;;  %v820_v42 = vmul.f32 %v1964_v38, %v1964_v38  ;;  %v725_v43 = vpop.f32.mrb[2].mxu1  ;;  %v802_v44 = vpop.f32.mrb[4].mxu0  ;;  %v822_v55 = vmul.f32 %v1968_v40, %v1968_v40 }
 0x2b5   : > { %v1976_v46 = vadd.f32 %v725_v43, %v636_v28  ;;  %v727_v47 = vpop.f32.mrb[3].mxu1  ;;  %v804_v48 = vpop.f32.mrb[5].mxu0  ;;  %v1978_v49 = vadd.f32 %v802_v44, %v644_v29  ;;  %v1001_v28 = vld [vmem:[#allocation5 + $0x1a0] sm:$0xff]  ;;  %v1459_v29 = vpack.c.bf16 %v970_v10, %v969_v23  ;;  %v972_v43 = vld [vmem:[#allocation5 + $0xb8] sm:$0xff]  ;;  %v1003_v44 = vld [vmem:[#allocation5 + $0x1b0] sm:$0xff] }
 0x2b6   : > { %v1980_v50 = vadd.f32 %v727_v47, %v640_v30  ;;  %v810_v51 = vadd.f32 %v809_v41, %v1962_v35  ;;  %v827_v52 = vadd.f32 %v820_v42, %v819_v39  ;;  %v1985_v54 = vadd.f32 %v804_v48, %v648_v31  ;;  %v1002_v30 = vld [vmem:[#allocation5 + $0x1a8] sm:$0xff]  ;;  %v953_v31 = vld [vmem:[#allocation5 + $0x20] sm:$0xff]  ;;  %v971_v42 = vld [vmem:[#allocation5 + $0xb0] sm:$0xff] }
 0x2b7   : > { %v823_v53 = vmul.f32 %v1976_v46, %v1976_v46  ;;  %v825_v60 = vmul.f32 %v1978_v49, %v1978_v49  ;;  %v1491_v33 = vpack.c.bf16 %v1002_v30, %v1001_v28  ;;  %v1461_v36 = vpack.c.bf16 %v954_v32, %v953_v31  ;;  %v986_v39 = vld [vmem:[#allocation5 + $0x128] sm:$0xff]  ;;  %1460 = vmatprep.subr.bf16.mxu1 %v1459_v29  ;;  %v1004_v47 = vld [vmem:[#allocation5 + $0x1b8] sm:$0xff]  ;;  %v955_v48 = vld [vmem:[#allocation5 + $0x30] sm:$0xff] }
 0x2b8   : > { %v814_v56 = vadd.f32 %v1980_v50, %v1976_v46  ;;  %v824_v57 = vmul.f32 %v1980_v50, %v1980_v50  ;;  %v811_v58 = vadd.f32 %v810_v51, %v1968_v40  ;;  %v828_v59 = vadd.f32 %v827_v52, %v821_v45  ;;  %v956_v51 = vld [vmem:[#allocation5 + $0x38] sm:$0xff]  ;;  %v1010_v23 = vld [vmem:[#allocation5 + $0x1e8] sm:$0xff]  ;;  %v961_v10 = vld [vmem:[#allocation5 + $0x60] sm:$0xff] }
 0x2b9   : > { %v826_v1 = vmul.f32 %v1985_v54, %v1985_v54  ;;  %v1493_v41 = vpack.c.bf16 %v986_v39, %v985_v37  ;;  %1492 = vmatprep.subr.bf16.mxu0 %v1491_v33  ;;  %1462 = vmatpush3.bf16.msra.mxu1 %v1461_v36  ;;  %v1463_v45 = vpack.c.bf16 %v972_v43, %v971_v42  ;;  %v962_v29 = vld [vmem:[#allocation5 + $0x68] sm:$0xff]  ;;  %v993_v30 = vld [vmem:[#allocation5 + $0x160] sm:$0xff]  ;;  %v979_v33 = vld [vmem:[#allocation5 + $0xf0] sm:$0xff] }
 0x2ba   : > { %812 = vadd.xlane.f32.xlu0 %v811_v58  ;;  %v829_v61 = vadd.f32 %v828_v59, %v822_v55  ;;  %v815_v62 = vadd.f32 %v814_v56, %v1978_v49  ;;  %v832_v63 = vadd.f32 %v824_v57, %v823_v53  ;;  %v1495_v52 = vpack.c.bf16 %v1004_v47, %v1003_v44  ;;  %v987_v55 = vld [vmem:[#allocation5 + $0x130] sm:$0xff]  ;;  %v988_v56 = vld [vmem:[#allocation5 + $0x138] sm:$0xff]  ;;  %v973_v58 = vld [vmem:[#allocation5 + $0xc0] sm:$0xff] }
 0x2bb   : > { %1494 = vmatpush3.bf16.msra.mxu0 %v1493_v41  ;;  %v1465_v53 = vpack.c.bf16 %v956_v51, %v955_v48  ;;  %1464 = vmatprep.subr.bf16.mxu1 %v1463_v45  ;;  %v1497_v57 = vpack.c.bf16 %v988_v56, %v987_v55  ;;  %v974_v59 = vld [vmem:[#allocation5 + $0xc8] sm:$0xff]  ;;  %v1507_v28 = vpack.c.bf16 %v1010_v23, %v1009_v22  ;;  %v980_v36 = vld [vmem:[#allocation5 + $0xf8] sm:$0xff]  ;;  %v1011_v37 = vld [vmem:[#allocation5 + $0x1f0] sm:$0xff] }
 0x2bc   : > { %830 = vadd.xlane.f32.xlu1 %v829_v61  ;;  %v816_v0 = vadd.f32 %v815_v62, %v1985_v54  ;;  %v833_v2 = vadd.f32 %v832_v63, %v825_v60  ;;  %1496 = vmatprep.subr.bf16.mxu0 %v1495_v52  ;;  %v1005_v60 = vld [vmem:[#allocation5 + $0x1c0] sm:$0xff]  ;;  %v1467_v61 = vpack.c.bf16 %v974_v59, %v973_v58  ;;  %v1006_v62 = vld [vmem:[#allocation5 + $0x1c8] sm:$0xff]  ;;  %v1012_v42 = vld [vmem:[#allocation5 + $0x1f8] sm:$0xff] }
 0x2bd   : > { %1466 = vmatpush3.bf16.msra.mxu1 %v1465_v53  ;;  %v957_v63 = vld [vmem:[#allocation5 + $0x40] sm:$0xff]  ;;  %v994_v31 = vld [vmem:[#allocation5 + $0x168] sm:$0xff]  ;;  %v1477_v32 = vpack.c.bf16 %v962_v29, %v961_v10  ;;  %v1479_v41 = vpack.c.bf16 %v980_v36, %v979_v33  ;;  %v963_v43 = vld [vmem:[#allocation5 + $0x70] sm:$0xff]  ;;  %v1511_v45 = vpack.c.bf16 %v1012_v42, %v1011_v37 }
 0x2be   : > { %817 = vadd.xlane.f32.xlu0 %v816_v0  ;;  %v834_v3 = vadd.f32 %v833_v2, %v826_v1  ;;  %v958_v0 = vld [vmem:[#allocation5 + $0x48] sm:$0xff]  ;;  %v1499_v1 = vpack.c.bf16 %v1006_v62, %v1005_v60  ;;  %1468 = vmatprep.subr.bf16.mxu1 %v1467_v61  ;;  %v1509_v39 = vpack.c.bf16 %v994_v31, %v993_v30  ;;  %v964_v44 = vld [vmem:[#allocation5 + $0x78] sm:$0xff]  ;;  %v995_v47 = vld [vmem:[#allocation5 + $0x170] sm:$0xff] }
 0x2bf   : > { %1498 = vmatpush3.bf16.msra.mxu0 %v1497_v57  ;;  %v1469_v2 = vpack.c.bf16 %v958_v0, %v957_v63  ;;  %v996_v48 = vld [vmem:[#allocation5 + $0x178] sm:$0xff]  ;;  %v1481_v51 = vpack.c.bf16 %v964_v44, %v963_v43 }
 0x2c0   : > { %835 = vadd.xlane.f32.xlu1 %v834_v3  ;;  %v989_v3 = vld [vmem:[#allocation5 + $0x140] sm:$0xff]  ;;  %1500 = vmatprep.subr.bf16.mxu0 %v1499_v1  ;;  %v1513_v52 = vpack.c.bf16 %v996_v48, %v995_v47 }
 0x2c1   : > { %v1501_v6 = vpack.c.bf16 %v990_v4, %v989_v3  ;;  %1470 = vmatpush3.bf16.msra.mxu1 %v1469_v2 }
 0x2c2   : > { %1472 = vmatprep.subr.bf16.mxu1 %v1471_v13 }
 0x2c3   : > { %1502 = vmatpush3.bf16.msra.mxu0 %v1501_v6  ;;  %v807_v6 = vld [vmem:[%s2082_s7] sm:$0xf] }
 0x2c4   : > { %1504 = vmatprep.subr.bf16.mxu0 %v1503_v7  ;;  %v871_v11 = vrot.slane %v807_v6, %v1945_v24  ;;  %v879_v12 = vrot.slane %v807_v6, %v1947_v25  ;;  %v875_v13 = vrot.slane %v807_v6, %v1952_v26  ;;  %v883_v7 = vrot.slane %v807_v6, %v1954_v27 }
 0x2c5   : > { %1474 = vmatpush3.bf16.msra.mxu1 %v1473_v16 }
 0x2c6   : > { %1476 = vmatprep.subr.bf16.mxu1 %v1475_v21  ;;  %v912_v21 = vrot.slane %v808_v8, %v1954_v27 }
 0x2c7   : > { %1506 = vmatpush3.bf16.msra.mxu0 %v1505_v20  ;;  %v904_v20 = vrot.slane %v808_v8, %v1952_v26 }
 0x2c8   : > { %1508 = vmatprep.subr.bf16.mxu0 %v1507_v28 }
 0x2c9   : > { %1478 = vmatpush3.bf16.msra.mxu1 %v1477_v32 }
 0x2ca   : > { %1480 = vmatprep.subr.bf16.mxu1 %v1479_v41 }
 0x2cb   : > { %1510 = vmatpush3.bf16.msra.mxu0 %v1509_v39 }
 0x2cc   : > { %1512 = vmatprep.subr.bf16.mxu0 %v1511_v45 }
 0x2cd   : > { %1482 = vmatpush3.bf16.msra.mxu1 %v1481_v51 }
 0x2cf   : > { %1514 = vmatpush3.bf16.msra.mxu0 %v1513_v52 }
 0x347   : > { %v813_v53 = vpop.xlane.xlu0 %812 }
 0x348   : > { %v837_v55 = vmul.f32 0.001953125, %v813_v53 }
 0x349   : > { %v831_v56 = vpop.xlane.xlu1 %830 }
 0x34a   : > { %v839_v57 = vmul.f32 0.001953125, %v831_v56  ;;  %v841_v58 = vmul.f32 %v837_v55, %v837_v55  ;;  %v847_v14 = vsub.f32 %v1960_v34, %v837_v55  ;;  %v849_v15 = vsub.f32 %v1962_v35, %v837_v55 }
 0x34b   : > { %v818_v59 = vpop.xlane.xlu0 %817  ;;  %v848_v9 = vsub.f32 %v1964_v38, %v837_v55  ;;  %v850_v16 = vsub.f32 %v1968_v40, %v837_v55 }
 0x34c   : > { %v843_v60 = vsub.f32 %v839_v57, %v841_v58  ;;  %v838_v61 = vmul.f32 0.001953125, %v818_v59 }
 0x34d   : > { %v836_v62 = vpop.xlane.xlu1 %835 }
 0x34e   : > { %v845_v63 = vmax.f32 %v843_v60, 0.0  ;;  %v840_v0 = vmul.f32 0.001953125, %v836_v62  ;;  %v842_v1 = vmul.f32 %v838_v61, %v838_v61  ;;  %v852_v40 = vsub.f32 %v1980_v50, %v838_v61 }
 0x34f   : > { %v854_v31 = vsub.f32 %v1985_v54, %v838_v61  ;;  %v851_v24 = vsub.f32 %v1976_v46, %v838_v61  ;;  %v853_v25 = vsub.f32 %v1978_v49, %v838_v61 }
 0x350   : > { %v855_v2 = vadd.f32 1e-05, %v845_v63  ;;  %v844_v3 = vsub.f32 %v840_v0, %v842_v1 }
 0x352   : > { %1587 = vrsqrt.f32 %v855_v2  ;;  %v846_v4 = vmax.f32 %v844_v3, 0.0 }
 0x354   : > { %v856_v5 = vadd.f32 1e-05, %v846_v4  ;;  %v1287_v4 = vld [vmem:[%s2085_s10] ss:$0 sm:$0xff] }
 0x356   : > { %1589 = vrsqrt.f32 %v856_v5 }
 0x35c   : > { %v1588_v17 = vpop.eup %1587 }
 0x35d   : > { %v860_v22 = vmul.f32 %v1588_v17, %v848_v9  ;;  %v862_v23 = vmul.f32 %v1588_v17, %v850_v16  ;;  %v859_v10 = vmul.f32 %v1588_v17, %v847_v14  ;;  %v861_v28 = vmul.f32 %v1588_v17, %v849_v15 }
 0x35f   : > { %v889_v34 = vmul.f32 %v875_v13, %v860_v22  ;;  %v891_v29 = vmul.f32 %v883_v7, %v862_v23  ;;  %v888_v35 = vmul.f32 %v871_v11, %v859_v10  ;;  %v890_v30 = vmul.f32 %v879_v12, %v861_v28 }
 0x360   : > { %v1590_v38 = vpop.eup %1589 }
 0x361   : > { %v918_v26 = vadd.f32 %v904_v20, %v889_v34  ;;  %v920_v32 = vadd.f32 %v912_v21, %v891_v29  ;;  %v917_v27 = vadd.f32 %v900_v18, %v888_v35  ;;  %v919_v33 = vadd.f32 %v908_v19, %v890_v30 }
 0x362   : > { %v864_v36 = vmul.f32 %v1590_v38, %v852_v40  ;;  %v866_v37 = vmul.f32 %v1590_v38, %v854_v31  ;;  %v863_v39 = vmul.f32 %v1590_v38, %v851_v24  ;;  %v865_v41 = vmul.f32 %v1590_v38, %v853_v25 }
 0x363   : > { %vm926_vm6 = vcmp.gt.f32.partialorder %v918_v26, 0.0  ;;  %v934_v42 = vmul.f32 0.01, %v918_v26  ;;  %vm928_vm7 = vcmp.gt.f32.partialorder %v920_v32, 0.0  ;;  %v936_v43 = vmul.f32 0.01, %v920_v32 }
 0x364   : > { %vm925_vm8 = vcmp.gt.f32.partialorder %v917_v27, 0.0  ;;  %v933_v50 = vmul.f32 0.01, %v917_v27  ;;  %vm927_vm9 = vcmp.gt.f32.partialorder %v919_v33, 0.0  ;;  %v935_v54 = vmul.f32 0.01, %v919_v33 }
 0x365   : > { %v942_v44 = vsel %vm926_vm6, %v918_v26, %v934_v42  ;;  %v944_v46 = vsel %vm928_vm7, %v920_v32, %v936_v43  ;;  %v893_v45 = vmul.f32 %v875_v13, %v864_v36  ;;  %v895_v49 = vmul.f32 %v883_v7, %v866_v37 }
 0x366   : > { %1084 = vmatprep.mubr.f32.mxu1 %v942_v44  ;;  %1159 = vmatprep.mubr.f32.mxu0 %v944_v46  ;;  %v941_v47 = vsel %vm925_vm8, %v917_v27, %v933_v50  ;;  %v943_v48 = vsel %vm927_vm9, %v919_v33, %v935_v54  ;;  %v892_v51 = vmul.f32 %v871_v11, %v863_v39 }
 0x367   : > { %1085 = vmatmul.mubr.f32.vlgmr.msra.gmra.mrb[4].mxu1 %v941_v47  ;;  %1160 = vmatmul.mubr.f32.vlgmr.msra.gmra.mrb[6].mxu0 %v943_v48  ;;  %v922_v52 = vadd.f32 %v904_v20, %v893_v45  ;;  %v924_v53 = vadd.f32 %v912_v21, %v895_v49  ;;  %v894_v55 = vmul.f32 %v879_v12, %v865_v41 }
 0x368   : > { %v921_v56 = vadd.f32 %v900_v18, %v892_v51 }
 0x369   : > { %vm930_vm10 = vcmp.gt.f32.partialorder %v922_v52, 0.0  ;;  %v938_v57 = vmul.f32 0.01, %v922_v52  ;;  %vm932_vm11 = vcmp.gt.f32.partialorder %v924_v53, 0.0  ;;  %v940_v58 = vmul.f32 0.01, %v924_v53 }
 0x36a   : > { %vm929_vm12 = vcmp.gt.f32.partialorder %v921_v56, 0.0  ;;  %v937_v59 = vmul.f32 0.01, %v921_v56  ;;  %v923_v60 = vadd.f32 %v908_v19, %v894_v55 }
 0x36b   : > { %v946_v61 = vsel %vm930_vm10, %v922_v52, %v938_v57  ;;  %v948_v62 = vsel %vm932_vm11, %v924_v53, %v940_v58 }
 0x36c   : > { %1089 = vmatprep.mubr.f32.mxu1 %v946_v61  ;;  %1164 = vmatprep.mubr.f32.mxu0 %v948_v62  ;;  %v945_v63 = vsel %vm929_vm12, %v921_v56, %v937_v59  ;;  %vm931_vm13 = vcmp.gt.f32.partialorder %v923_v60, 0.0  ;;  %v939_v0 = vmul.f32 0.01, %v923_v60 }
 0x36d   : > { %1090 = vmatmul.mubr.f32.gmra.mrb[6].mxu1 %v945_v63 }
 0x36e   : > { %v947_v1 = vsel %vm931_vm13, %v923_v60, %v939_v0 }
 0x36f   : > { %1165 = vmatmul.mubr.f32.gmra.mrb[8].mxu0 %v947_v1 }
 0x43a   : > { %v1330_v2 = vpop.f32.mrb[4].mxu1  ;;  %v1368_v3 = vpop.f32.mrb[6].mxu0 }
 0x43b   : > { %v1331_v5 = vpop.f32.mrb[5].mxu1  ;;  %v1369_v6 = vpop.f32.mrb[7].mxu0 }
 0x43c   : > { %v1332_v8 = vadd.f32 %v1331_v5, %v1330_v2  ;;  %v1370_v11 = vadd.f32 %v1369_v6, %v1368_v3 }
 0x43e   : > { %v1087_v12 = vadd.f32 %v1332_v8, %v1287_v4 }
 0x440   : > { %v1162_v13 = vadd.f32 %v1370_v11, %v1087_v12  ;;  %v1333_v7 = vpop.f32.mrb[6].mxu1 }
 0x441   : > { %v1334_v14 = vpop.f32.mrb[7].mxu1 }
 0x442   : > { %1170 = vst [vmem:[%s410_s12] sm:$0xff] %v1162_v13  ;;  %v1371_v15 = vpop.f32.mrb[8].mxu0  ;;  %v1335_v9 = vadd.f32 %v1334_v14, %v1333_v7 }
 0x443   : > { %v1372_v16 = vpop.f32.mrb[9].mxu0 }
 0x444   : > { %v1092_v17 = vadd.f32 %v1335_v9, %v1287_v4  ;;  %v1373_v18 = vadd.f32 %v1372_v16, %v1371_v15 }
 0x446   : > { %v1167_v19 = vadd.f32 %v1373_v18, %v1092_v17 }
 0x448   : > { %1171 = vst [vmem:[%s410_s12 + $0x8] sm:$0xff] %v1167_v19 }
 0x449   : > { %1660 = shalt.err (!%p1657_p11)
}
 0x44a   : > { %s1661_s26 = scalar_lea.hbm %s2032_s13, 256  ;;  %s1665_s30 = scalar_lea.hbm %s2086_s11, 512 }
 0x44b   : > { %p1662_p13 = scmp.ne.s32.totalorder %s2032_s13, %s1661_s26  ;;  %p1666_p6 = scmp.lt.u32.totalorder %s2032_s13, %s2086_s11 }
 0x44c   : > { %p1667_p9 = scmp.lt.u32.totalorder %s1665_s30, %s1661_s26  ;;  %p1669_p12 = scmp.lt.u32.totalorder %s1661_s26, %s2032_s13 }
 0x44d   : > { %p1663_p0 = pnand %p1662_p13, %p2109_p1 }
 0x44e   : > { %p1668_p10 = por %p1667_p9, %p1666_p6 }
 0x44f   : > { %p1664_p5 = pneg %p1663_p0 }
 0x450   : > { %p1670_p2 = por %p1669_p12, %p1668_p10 }
 0x452   : > { %p1671_p3 = pnand %p1670_p2, %p1664_p5 }
 0x454   : > { %1674 = shalt.err (!%p1671_p3)
}
 0x455   : > { %s1728_s23 = smov 128   ;;  %s1729_s28 = smov 8  }
 0x456   : > { %1523 = dma.vmem_to_hbm [thread:$0]  (%p2109_p1), %s2027_s17, 256, %s2032_s13, %s2034_s15, %s1728_s23, %s1728_s23, %s1729_s28  }
 0x457 PF: > { %s2110_s16 = sld [smem:[#allocation11_spill]]  ;;  %s2111_s29 = sld [smem:[#allocation15_spill]] }
 0x458   : > { %p1540_p4 = scmp.ge.s32.totalorder %s1717_s20, 2 }
 0x45d   : > { %s1201_s21 = sand.u32 1, %s2110_s16   ;;  %p2112_p7 = scmp.ne.s32.totalorder %s2111_s29, 0 }
 0x45e   : > { %s1202_s22 = scalar_lea.sflag [#allocation4], %s1201_s21 }
 0x45f   : > { %p1533_p8 = pnand %p1540_p4, %p2112_p7 }
 0x461   : > { %1700 = dma.done.wait (!%p1533_p8), %s1202_s22, 256  }
 0x462   : > { %1702 = vsyncadd (!%p1533_p8), %s1202_s22, 4294967040  ;;  %s2113_s20 = sld [smem:[#allocation13_spill]]  ;;  %s2114_s19 = sld [smem:[#allocation12_spill]] }
 0x463   : > { %s2115_s26 = sld [smem:[#allocation14_spill]]  ;;  %s2116_s17 = smov %s1709_s18 }
 0x468   : > { %p23_p11 = scmp.ge.s32.totalorder %s2113_s20, 4   ;;  %s2117_s18 = smov %s2114_s19 }
 0x469   : > { %s2118_s19 = smov %s2115_s26 }
 0x46a   :  { %25 = sbr.rel (!%p23_p11) target bundleno = 5 (0x5), region = 108 }
 0x471   :  { %1207 = vsyncpa [#allocation3], 1 }
 0x472   :  { %1209 = vsyncpa [#allocation3 + $0x1], 1 }
 0x473   :  { %1210 = vsyncpa [#allocation6], 1 }
 0x474   :  { %1211 = vsyncpa [#allocation4], 1 }
 0x475   :  { %1213 = vsyncpa [#allocation4 + $0x1], 1 }

</bundles_post_ra>
